<compile_context>
chip_gen: v5e
topology: v5e:2x2
jax: 0.10.0
libtpu: 0.0.40
codegen_flags: <defaults>
</compile_context>

<pallas_src>
import math
import functools

import jax
import jax.numpy as jnp
from jax.experimental import pallas as pl
from jax.experimental.pallas import tpu as pltpu


def _round_up(x, m):
    return ((x + m - 1) // m) * m


def _gat_kernel(has_spare, g0_ref, a_ref, w_ref, dst_ref, o_ref):
    """One (N-tile, head) grid step. All head-invariant heavy data is VMEM-resident.

    g0_ref : (E_pad, F_pad)  h[src], zero-padded; lane F_pad-1 == 1.0 if has_spare
    a_ref  : (1, 1, F_pad)   per-head effective score vector  w_cum * a  (pad lanes 0)
    w_ref  : (1, 1, F_pad)   per-head cumulative diag scale (pad lanes 1)
    dst_ref: (TN, E_pad)     destination one-hot tile (padded edges -> zero columns)
    o_ref  : (1, TN, F_pad)
    """
    Fp = g0_ref.shape[1]
    g0 = g0_ref[...]
    dst_oh = dst_ref[...]

    # Per-edge attention score: sum_f h[src,f] * w_cum[f] * a[f]   (XLU lane reduce)
    score = jnp.sum(g0 * a_ref[0], axis=-1, keepdims=True)          # (E, 1)
    leaky = jnp.where(score >= 0.0, score, 0.2 * score)
    edge_e = jnp.exp(-leaky)                                        # (E, 1)  EUP

    # Weighted edge features. If a spare pad lane exists, g0's lane F_pad-1 is 1.0
    # (set in the wrapper), so that lane carries edge_e through the scatter matmul
    # and the row-sum comes out for free.
    weighted = g0 * edge_e                                          # (E, Fp)

    # Scatter-add by destination: one MXU matmul (TN, E) @ (E, Fp).
    scattered = jnp.dot(dst_oh, weighted,
                        preferred_element_type=jnp.float32)         # (TN, Fp)

    if has_spare:
        rowsum = scattered[:, Fp - 1:Fp]                            # (TN, 1)
    else:
        rowsum = jnp.dot(dst_oh, edge_e,
                         preferred_element_type=jnp.float32)        # (TN, 1)

    # reciprocal on (TN,1) + multiply instead of a (TN,Fp) broadcast divide.
    inv = pl.reciprocal(rowsum)                                     # exact
    # Apply the per-head diag scale after the scatter (commutes with the edge sum).
    o_ref[0] = (scattered * inv) * w_ref[0]


def rmulti_head_graph_attention(h, w, a_src_dst, src, dst):
    """h: (N, F); w: (n_head-1, 1, F); a_src_dst: (n_head, 2, F, 1);
    src/dst: (E,) int32 (src = A[2,:], dst = A[0,:]). Returns (n_head, N, F)."""
    N, F = h.shape
    n_head = a_src_dst.shape[0]
    E = src.shape[0]

    # MXU/lane-friendly padding (review: 128-aligned contraction & lane extents).
    N_pad = _round_up(max(N, 1), 128)
    E_pad = _round_up(max(E, 1), 128)
    if F % 128 == 0:
        F_pad = F
        has_spare = False      # never add a whole extra 128-lane tile just for rowsum
    else:
        F_pad = _round_up(F, 128)
        has_spare = True

    h32 = h.astype(jnp.float32)

    # Cumulative per-head diag scale (head 0 = ones); pad lanes stay 1.
    w_pad = jnp.ones((n_head, 1, F_pad), jnp.float32).at[1:, :, :F].set(w.astype(jnp.float32))
    w_cum = jnp.cumprod(w_pad, axis=0)                              # (n_head, 1, F_pad)

    # Effective per-head score vector a_eff = w_cum * a  (pad lanes 0).
    a_full = jnp.zeros((n_head, 1, F_pad), jnp.float32).at[:, 0, :F].set(
        a_src_dst[:, 0, :, 0].astype(jnp.float32))
    a_eff = w_cum * a_full

    # Head-invariant gather h[src] computed once (padded rows/lanes are zero).
    g0 = jnp.zeros((E_pad, F_pad), jnp.float32).at[:E, :F].set(h32[src])
    if has_spare:
        # Pinned spare lane carries edge_e (rowsum) through the scatter matmul.
        g0 = g0.at[:, F_pad - 1].set(1.0)

    # Head-invariant destination one-hot; padded edges get an out-of-range dst
    # index -> all-zero columns (contribute nothing).
    dst_idx = jnp.full((E_pad,), N_pad, jnp.int32).at[:E].set(dst.astype(jnp.int32))
    dst_oh = (jnp.arange(N_pad, dtype=jnp.int32)[:, None] == dst_idx[None, :]
              ).astype(jnp.float32)                                 # (N_pad, E_pad)

    # N-tile axis for megacore balance on v7x (no-op on single-TC chips).
    TN = 256 if (N_pad % 256 == 0) else 128
    num_n = N_pad // TN

    kernel = functools.partial(_gat_kernel, has_spare)

    grid_spec = pltpu.PrefetchScalarGridSpec(
        num_scalar_prefetch=0,
        # head axis innermost -> g0 and the dst one-hot tile stay VMEM-resident
        # across heads (constant block index => no re-DMA).
        grid=(num_n, n_head),
        in_specs=[
            pl.BlockSpec((E_pad, F_pad), lambda n, i: (0, 0)),      # g0 (invariant)
            pl.BlockSpec((1, 1, F_pad), lambda n, i: (i, 0, 0)),    # a_eff (per head)
            pl.BlockSpec((1, 1, F_pad), lambda n, i: (i, 0, 0)),    # w_cum (per head)
            pl.BlockSpec((TN, E_pad), lambda n, i: (n, 0)),         # dst one-hot tile
        ],
        out_specs=pl.BlockSpec((1, TN, F_pad), lambda n, i: (i, n, 0)),
    )

    out = pl.pallas_call(
        kernel,
        out_shape=jax.ShapeDtypeStruct((n_head, N_pad, F_pad), jnp.float32),
        grid_spec=grid_spec,
        compiler_params=pltpu.CompilerParams(
            dimension_semantics=("parallel", "parallel"),
            vmem_limit_bytes=32 * 1024 * 1024),
    )(g0, a_eff, w_cum, dst_oh)

    return out[:, :N, :F]


def reference_forward(h, w, a_src_dst, src, dst):
    """Pure-JAX reference reproducing the PyTorch forward (eval mode)."""
    n_head = a_src_dst.shape[0]
    N, F = h.shape
    outs = []
    hcur = h
    for i in range(n_head):
        if i >= 1:
            hcur = hcur * w[i - 1]                       # (N,F) * (1,F)
        edge_feat = hcur[src]                            # (E, F)
        score = edge_feat @ a_src_dst[i, 0]              # (E, 1)
        leaky = jnp.where(score >= 0, score, 0.2 * score)
        edge_e = jnp.exp(-leaky)[:, 0]                   # (E,)
        rowsum = jnp.zeros((N,), jnp.float32).at[dst].add(edge_e)
        hp = jnp.zeros((N, F), jnp.float32).at[dst].add(edge_feat * edge_e[:, None])
        outs.append(hp / rowsum[:, None])
    return jnp.stack(outs, axis=0)


if __name__ == "__main__":
    # Small deterministic problem: diag=True, bias=False, Rmode=''.
    N = 16        # nodes
    F = 32        # f_out (== f_in since diag=True)
    n_head = 3
    n_extra_edges = 32

    key = jax.random.PRNGKey(0)
    k_h, k_w, k_a, k_src, k_dst = jax.random.split(key, 5)

    h = jax.random.normal(k_h, (N, F), dtype=jnp.float32)

    # Parameters (deterministic synthetic init, shapes match the module's __init__):
    #   self.w         : (n_head - 1, 1, f_out)
    #   self.a_src_dst : (n_head, 2, f_out, 1),  std = 1/sqrt(2 * f_out)
    w = jax.random.normal(k_w, (n_head - 1, 1, F), dtype=jnp.float32) * (1.0 / math.sqrt(F))
    a_src_dst = jax.random.normal(k_a, (n_head, 2, F, 1), dtype=jnp.float32) * (1.0 / math.sqrt(2 * F))

    # Edge list A: row 0 = dst, row 2 = src. Self-loops guarantee every node has
    # at least one incoming edge (avoids 0/0, as assumed by the PyTorch code).
    self_idx = jnp.arange(N, dtype=jnp.int32)
    rand_src = jax.random.randint(k_src, (n_extra_edges,), 0, N, dtype=jnp.int32)
    rand_dst = jax.random.randint(k_dst, (n_extra_edges,), 0, N, dtype=jnp.int32)
    src = jnp.concatenate([self_idx, rand_src])   # A[2, :]
    dst = jnp.concatenate([self_idx, rand_dst])   # A[0, :]

    out = rmulti_head_graph_attention(h, w, a_src_dst, src, dst)
    out = jax.block_until_ready(out)

    ref = reference_forward(h, w, a_src_dst, src, dst)
    assert out.shape == (n_head, N, F)
    assert jnp.allclose(out, ref, rtol=1e-4, atol=1e-4), (
        f"max abs err = {jnp.max(jnp.abs(out - ref))}")

    print("KERNEL_OK")
</pallas_src>

<mosaic_0001>
module attributes {stable_mosaic.version = 11 : i64} {
  func.func @_gat_kernel(%arg0: i32, %arg1: i32, %arg2: memref<128x128xf32, #tpu.memory_space<vmem>>, %arg3: memref<1x1x128xf32, #tpu.memory_space<vmem>>, %arg4: memref<1x1x128xf32, #tpu.memory_space<vmem>>, %arg5: memref<128x128xf32, #tpu.memory_space<vmem>>, %arg6: memref<1x128x128xf32, #tpu.memory_space<vmem>>) attributes {dimension_semantics = [#tpu.dimension_semantics<parallel>, #tpu.dimension_semantics<parallel>], iteration_bounds = array<i64: 1, 3>, scalar_prefetch = 0 : i64, scratch_operands = 0 : i64, tpu.core_type = #tpu.core_type<tc>, window_params = [{pipeline_mode = #tpu.pipeline_mode<synchronous>, transform_indices = @transform_0, window_bounds = array<i64: 128, 128>}, {transform_indices = @transform_1, window_bounds = array<i64: 1, 1, 128>}, {transform_indices = @transform_2, window_bounds = array<i64: 1, 1, 128>}, {transform_indices = @transform_3, window_bounds = array<i64: 128, 128>}, {transform_indices = @transform_4, window_bounds = array<i64: 1, 128, 128>}]} {
    %c0 = arith.constant 0 : index
    %c0_0 = arith.constant 0 : index
    %0 = vector.load %arg2[%c0, %c0_0] : memref<128x128xf32, #tpu.memory_space<vmem>>, vector<128x128xf32>
    %c0_1 = arith.constant 0 : index
    %c0_2 = arith.constant 0 : index
    %1 = vector.load %arg5[%c0_1, %c0_2] : memref<128x128xf32, #tpu.memory_space<vmem>>, vector<128x128xf32>
    %c0_3 = arith.constant 0 : index
    %c0_4 = arith.constant 0 : index
    %c0_5 = arith.constant 0 : index
    %2 = vector.load %arg3[%c0_3, %c0_4, %c0_5] : memref<1x1x128xf32, #tpu.memory_space<vmem>>, vector<1x1x128xf32>
    %3 = vector.shape_cast %2 : vector<1x1x128xf32> to vector<1x128xf32>
    %4 = vector.broadcast %3 : vector<1x128xf32> to vector<128x128xf32>
    %5 = arith.mulf %0, %4 : vector<128x128xf32>
    %cst = arith.constant dense<0.000000e+00> : vector<128xf32>
    %6 = vector.multi_reduction <add>, %5, %cst [1] : vector<128x128xf32> to vector<128xf32>
    %7 = vector.shape_cast %6 : vector<128xf32> to vector<128x1xf32>
    %cst_6 = arith.constant 0.000000e+00 : f32
    %8 = vector.broadcast %cst_6 : f32 to vector<128x1xf32>
    %9 = arith.cmpf oge, %7, %8 : vector<128x1xf32>
    %cst_7 = arith.constant 2.000000e-01 : f32
    %10 = vector.broadcast %cst_7 : f32 to vector<128x1xf32>
    %11 = arith.mulf %10, %7 : vector<128x1xf32>
    %12 = arith.select %9, %7, %11 : vector<128x1xi1>, vector<128x1xf32>
    %cst_8 = arith.constant 0.000000e+00 : f32
    %13 = vector.broadcast %cst_8 : f32 to vector<128x1xf32>
    %14 = arith.subf %13, %12 : vector<128x1xf32>
    %15 = math.exp %14 : vector<128x1xf32>
    %16 = vector.broadcast %15 : vector<128x1xf32> to vector<128x128xf32>
    %17 = arith.mulf %0, %16 : vector<128x128xf32>
    %cst_9 = arith.constant dense<0.000000e+00> : vector<128x128xf32>
    %18 = tpu.matmul %1, %17, %cst_9 {dimension_numbers = #tpu.dot_dimension_numbers<[1], [0], [0], [1], [0, 0, 1, 1], [], []>} : vector<128x128xf32>, vector<128x128xf32>, vector<128x128xf32> -> vector<128x128xf32>
    %19 = vector.extract_strided_slice %18 {offsets = [0, 127], sizes = [128, 1], strides = [1, 1]} : vector<128x128xf32> to vector<128x1xf32>
    %20 = tpu.reciprocal %19 : vector<128x1xf32> -> vector<128x1xf32>
    %21 = vector.broadcast %20 : vector<128x1xf32> to vector<128x128xf32>
    %22 = arith.mulf %18, %21 : vector<128x128xf32>
    %c0_10 = arith.constant 0 : index
    %c0_11 = arith.constant 0 : index
    %c0_12 = arith.constant 0 : index
    %23 = vector.load %arg4[%c0_10, %c0_11, %c0_12] : memref<1x1x128xf32, #tpu.memory_space<vmem>>, vector<1x1x128xf32>
    %24 = vector.shape_cast %23 : vector<1x1x128xf32> to vector<1x128xf32>
    %25 = vector.broadcast %24 : vector<1x128xf32> to vector<128x128xf32>
    %26 = arith.mulf %22, %25 : vector<128x128xf32>
    %c0_13 = arith.constant 0 : index
    %c0_14 = arith.constant 0 : index
    %c0_15 = arith.constant 0 : index
    %27 = vector.load %arg6[%c0_13, %c0_14, %c0_15] : memref<1x128x128xf32, #tpu.memory_space<vmem>>, vector<1x128x128xf32>
    %28 = vector.shape_cast %27 : vector<1x128x128xf32> to vector<128x128xf32>
    %29 = vector.shape_cast %26 : vector<128x128xf32> to vector<1x128x128xf32>
    tpu.vector_store %arg6[%c0_13, %c0_14, %c0_15], %29 {strides = array<i32>} : memref<1x128x128xf32, #tpu.memory_space<vmem>>, vector<1x128x128xf32>,
    return
  }
  func.func @transform_0(%arg0: i32, %arg1: i32) -> (i32, i32) {
    %c0_i32 = arith.constant 0 : i32
    %c0_i32_0 = arith.constant 0 : i32
    %c0_i32_1 = arith.constant 0 : i32
    return %c0_i32, %c0_i32_0 : i32, i32
  }
  func.func @transform_1(%arg0: i32, %arg1: i32) -> (i32, i32, i32) {
    %c0_i32 = arith.constant 0 : i32
    %c0_i32_0 = arith.constant 0 : i32
    %c0_i32_1 = arith.constant 0 : i32
    return %arg1, %c0_i32, %c0_i32_0 : i32, i32, i32
  }
  func.func @transform_2(%arg0: i32, %arg1: i32) -> (i32, i32, i32) {
    %c0_i32 = arith.constant 0 : i32
    %c0_i32_0 = arith.constant 0 : i32
    %c0_i32_1 = arith.constant 0 : i32
    return %arg1, %c0_i32, %c0_i32_0 : i32, i32, i32
  }
  func.func @transform_3(%arg0: i32, %arg1: i32) -> (i32, i32) {
    %c0_i32 = arith.constant 0 : i32
    %c0_i32_0 = arith.constant 0 : i32
    return %arg0, %c0_i32 : i32, i32
  }
  func.func @transform_4(%arg0: i32, %arg1: i32) -> (i32, i32, i32) {
    %c0_i32 = arith.constant 0 : i32
    %c0_i32_0 = arith.constant 0 : i32
    return %arg1, %arg0, %c0_i32 : i32, i32, i32
  }
}

</mosaic_0001>

<bundles_post_ra>
// kernel: tpu_custom_call.1
= control target key start
LH: loop header
LB: loop body
LE: loop exit
PB: predicated region body
PF: predicated region fallthrough
CT: control target
= control target key end

     0   :  { %s2164_s0 = inlined_call_operand.hbm [shape: f32[128,128], index: 0, kind: input, shape index: {}]   ;;  %s2165_s1 = inlined_call_operand.hbm [shape: f32[3,1,128], index: 1, kind: input, shape index: {}]   ;;  %s2166_s2 = inlined_call_operand.hbm [shape: f32[3,1,128], index: 2, kind: input, shape index: {}]   ;;  %s2167_s3 = inlined_call_operand.hbm [shape: f32[128,128], index: 3, kind: input, shape index: {}]   ;;  %s2168_s4 = inlined_call_operand.hbm [shape: f32[3,128,128], index: 4, kind: output, shape index: {}]  }
   0x1   :  { %2170 = sst [smem:[#allocation15_spill]] %s2164_s0 }
   0x2   :  { %2171 = sst [smem:[#allocation16_spill]] %s2165_s1 }
   0x3   :  { %2172 = sst [smem:[#allocation17_spill]] %s2167_s3 }
   0x4   :  { %9 = vsyncpa [#allocation3], 0 }
   0x5   :  { %10 = vsyncpa [#allocation6], 0 }
   0x6   :  { %12 = vsyncpa [#allocation6 + $0x1], 0 }
   0x7   :  { %13 = vsyncpa [#allocation9], 0 }
   0x8   :  { %14 = vsyncpa [#allocation4], 0 }
   0x9   :  { %16 = vsyncpa [#allocation4 + $0x1], 0  ;;  %s1526_s15 = smov 0   ;;  %s1528_s16 = smov 0  }
   0xa   :  { %s1530_s17 = smov 0   ;;  %s1532_s18 = smov 0  }
   0xb   :  { %s1534_s19 = smov 0   ;;  %s1536_s20 = smov 0  }
   0xc LB: > { %s1557_s21 = sadd.s32 4294967295, %s1492_s20   ;;  %s1057_s22 = sadd.s32 4294967294, %s1492_s20   ;;  %s1492_s20 = sphi %s1536_s20, %s22_s20   ;;  %s1488_s19 = sphi %s1534_s19, %s2217_s19   ;;  %s1484_s18 = sphi %s1532_s18, %s2216_s18   ;;  %s1480_s17 = sphi %s1530_s17, %s2215_s17   ;;  %s1476_s16 = sphi %s1528_s16, %s2214_s16   ;;  %s1472_s15 = sphi %s1526_s15, %s2213_s15  }
   0xd   : > { %s31_s23 = sadd.s32 1, %s1488_s19  ;;  %s62_s24 = sadd.s32 1, %s1480_s17 }
   0xe   : > { %p32_p0 = scmp.ge.s32.totalorder %s31_s23, 3  ;;  %p69_p1 = scmp.ne.s32.totalorder %s1480_s17, %s1476_s16 }
   0xf   : > { %p70_p2 = scmp.eq.s32.totalorder %s1492_s20, 0  ;;  %p75_p3 = scmp.ne.s32.totalorder %s1476_s16, %s1472_s15 }
  0x10   : > { %s2219_s23 = smov (%p32_p0, %s31_s23), 0  ;;  %p153_p5 = scmp.eq.s32.totalorder %s1557_s21, 2 }
  0x11   : > { %p1569_p4 = por %p70_p2, %p69_p1  ;;  %s59_s26 = ssub.s32 %s1488_s19, %s2219_s23 }
  0x12   : > { %p159_p6 = scmp.eq.s32.totalorder %s1057_s22, 2  ;;  %p60_p7 = scmp.eq.s32.totalorder %s59_s26, 0 }
  0x13   : > { %p1576_p8 = por %p153_p5, %p69_p1  ;;  %p1154_p10 = scmp.lt.s32.totalorder %s1492_s20, 3 }
  0x14   : > { %p1583_p9 = por %p159_p6, %p75_p3  ;;  %s210_s30 = sand.u32 1, %s1492_s20  }
  0x15   : > { %s1588_s29 = scalar_select %p60_p7, %s1480_s17, %s62_s24  }
  0x16   : > { %s2169_s5 = sand.u32 1, %s1480_s17   ;;  %s2176_s1 = sld [smem:[#allocation16_spill]] }
  0x17   : > { %s213_s9 = scalar_lea.vmem [#allocation5], %s2169_s5  ;;  %p1601_p11 = pnand %p1154_p10, %p1569_p4 }
  0x18   : > { %s220_s10 = sshll.u32 %s213_s9, 4  ;;  %s1605_s13 = scalar_lea.sflag [#allocation6], %s210_s30  ;;  %s221_s10 = int_to_ptr.vmem [resolvable:$true] %s220_s10 }
  0x19   : > { %p76_p12 = scmp.eq.s32.totalorder %s1557_s21, 0  ;;  %p1058_p13 = scmp.ge.s32.totalorder %s1492_s20, 1 }
  0x1a   : > { %p166_p0 = scmp.lt.s32.totalorder %s1492_s20, 4  ;;  %s2178_s0 = sld [smem:[#allocation15_spill]] }
  0x1b   : > { %p1621_p1 = por %p76_p12, %p75_p3  ;;  %s1494_s30 = smov [#allocation2]  }
  0x1c   : > { %s216_s8 = scalar_lea.hbm %s2176_s1, %s1488_s19  ;;  %p1625_p2 = pnand %p1058_p13, %p166_p0 }
  0x1d   : > { %s218_s11 = sshll.u32 %s216_s8, 4  ;;  %s179_s6 = sshll.u32 %s1494_s30, 4  ;;  %s219_s11 = int_to_ptr.hbm [resolvable:$true] %s218_s11  ;;  %s180_s6 = int_to_ptr.vmem [resolvable:$true] %s179_s6 }
  0x1e   : > { %1144 = dma.hbm_to_vmem [thread:$0]  (!%p1601_p11), %s219_s11, 16, %s221_s10, %s1605_s13  }
  0x1f   : > { %p1134_p4 = pneg %p1625_p2  ;;  %s2181_s3 = sld [smem:[#allocation17_spill]] }
  0x20   : > { %s177_s24 = sshll.u32 %s2178_s0, 4  ;;  %s233_s14 = scalar_lea.hbm %s2166_s2, %s1488_s19  ;;  %s178_s24 = int_to_ptr.hbm [resolvable:$true] %s177_s24 }
  0x21   : > { %p1135_p3 = pnand %p1134_p4, %p76_p12  ;;  %s1495_s22 = smov [#allocation8]  }
  0x22   : > { %s196_s5 = sshll.u32 %s1495_s22, 4  ;;  %s1496_s30 = smov 128   ;;  %s197_s5 = int_to_ptr.vmem [resolvable:$true] %s196_s5 }
  0x23   : > { %s1497_s0 = smov 8   ;;  %s235_s1 = sshll.u32 %s233_s14, 4  ;;  %s236_s1 = int_to_ptr.hbm [resolvable:$true] %s235_s1 }
  0x24   : > { %1137 = dma.hbm_to_vmem [thread:$0]  (!%p1135_p3), %s178_s24, 2048, %s180_s6, [#allocation3], %s1496_s30, %s1496_s30, %s1497_s0  }
  0x25   : > { %s194_s9 = sshll.u32 %s2181_s3, 4  ;;  %s2182_s7 = sand.u32 1, %s1480_s17   ;;  %s195_s9 = int_to_ptr.hbm [resolvable:$true] %s194_s9 }
  0x26   : > { %1140 = dma.hbm_to_vmem [thread:$0]  (!%p1135_p3), %s195_s9, 2048, %s197_s5, [#allocation9], %s1496_s30, %s1496_s30, %s1497_s0  }
  0x27   : > { %s230_s8 = scalar_lea.vmem [#allocation7], %s2182_s7  ;;  %246 = sbr.rel (%p1625_p2) target bundleno = 533 (0x215), region = 36 }
  0x28   : > { %s237_s3 = sshll.u32 %s230_s8, 4  ;;  %s238_s3 = int_to_ptr.vmem [resolvable:$true] %s237_s3 }
  0x29   : > { %1147 = dma.hbm_to_vmem [thread:$0]  (!%p1601_p11), %s236_s1, 16, %s238_s3, %s1605_s13  }
  0x2c   : > { %1455 = dma.done.wait (%p76_p12), [#allocation3], 2048  }
  0x2d   : > { %1457 = vsyncadd (%p76_p12), [#allocation3], 4294965248  ;;  %s253_s0 = sand.u32 1, %s1557_s21   ;;  %s1653_s5 = sand.u32 1, %s1476_s16  }
  0x2e   : > { %s254_s24 = scalar_lea.sflag [#allocation6], %s253_s0  ;;  %s256_s6 = scalar_lea.vmem [#allocation5], %s1653_s5 }
  0x2f   : > { %1459 = dma.done.wait (%p1621_p1), %s254_s24, 32  }
  0x30   : > { %1461 = vsyncadd (%p1621_p1), %s254_s24, 4294967264  ;;  %s265_s1 = scalar_lea.vmem [#allocation7], %s1653_s5 }
  0x31   : > { %1463 = dma.done.wait (%p76_p12), [#allocation9], 2048  }
  0x32   : > { %1465 = vsyncadd (%p76_p12), [#allocation9], 4294965248  ;;  %v1665_v0 = vld [vmem:[#allocation2 + $0x78] sm:$0xff]  ;;  %v1216_v1 = vld [vmem:[%s256_s6] ss:$0 sm:$0xff]  ;;  %s1065_s3 = sshll.u32 %s1653_s5, 7 }
  0x33   : > { %v1667_v2 = vld [vmem:[#allocation2 + $0x68] sm:$0xff]  ;;  %v1669_v3 = vld [vmem:[#allocation2 + $0x58] sm:$0xff]  ;;  %v352_v4 = vmul.f32 %v1216_v1, %v1665_v0  ;;  %v1674_v7 = vld [vmem:[#allocation2 + $0x70] sm:$0xff]  ;;  %s2078_s21 = scalar_lea.vmem [#allocation10], %s1065_s3  ;;  %s1071_s12 = sshll.u32 %s1484_s18, 7 }
  0x34   : > { %v350_v5 = vmul.f32 %v1216_v1, %v1667_v2  ;;  %v348_v6 = vmul.f32 %v1216_v1, %v1669_v3  ;;  %v1676_v8 = vld [vmem:[#allocation2 + $0x60] sm:$0xff]  ;;  %v1678_v9 = vld [vmem:[#allocation2 + $0x50] sm:$0xff]  ;;  %v351_v10 = vmul.f32 %v1216_v1, %v1674_v7  ;;  %v1683_v13 = vld [vmem:[#allocation2 + $0x48] sm:$0xff]  ;;  %s932_s26 = scalar_lea.hbm %s2168_s4, %s1071_s12  ;;  %s933_s9 = sshll.u32 %s2078_s21, 4  ;;  %s934_s9 = int_to_ptr.vmem [resolvable:$true] %s933_s9 }
  0x35   : > { %383 = vadd.xlane.f32.xlu0 %v352_v4  ;;  %v349_v11 = vmul.f32 %v1216_v1, %v1676_v8  ;;  %v347_v12 = vmul.f32 %v1216_v1, %v1678_v9  ;;  %v1685_v14 = vld [vmem:[#allocation2 + $0x40] sm:$0xff]  ;;  %v1687_v15 = vld [vmem:[#allocation2 + $0x38] sm:$0xff]  ;;  %v346_v16 = vmul.f32 %v1216_v1, %v1683_v13  ;;  %v1692_v19 = vld [vmem:[#allocation2 + $0x30] sm:$0xff]  ;;  %s935_s10 = sshll.u32 %s932_s26, 4  ;;  %s919_s18 = scalar_lea.sflag [#allocation4], %s1653_s5  ;;  %s936_s10 = int_to_ptr.hbm [resolvable:$true] %s935_s10 }
  0x36   : > { %379 = vadd.xlane.f32.xlu1 %v350_v5  ;;  %375 = vadd.xlane.f32.xlu2 %v348_v6  ;;  %v345_v17 = vmul.f32 %v1216_v1, %v1685_v14  ;;  %v344_v18 = vmul.f32 %v1216_v1, %v1687_v15  ;;  %v1694_v20 = vld [vmem:[#allocation2 + $0x28] sm:$0xff]  ;;  %v1696_v21 = vld [vmem:[#allocation2 + $0x20] sm:$0xff]  ;;  %v343_v22 = vmul.f32 %v1216_v1, %v1692_v19  ;;  %v1701_v25 = vld [vmem:[#allocation2 + $0x18] sm:$0xff]  ;;  %s1416_s11 = sshra.s32 %s936_s10, 4  ;;  %s1422_s7 = scalar_lea.hbm %s2168_s4, 384  ;;  %s1417_s11 = int_to_ptr.hbm [resolvable:$true] %s1416_s11 }
  0x37   : > { %v342_v23 = vmul.f32 %v1216_v1, %v1694_v20  ;;  %v341_v24 = vmul.f32 %v1216_v1, %v1696_v21  ;;  %v1703_v26 = vld [vmem:[#allocation2 + $0x10] sm:$0xff]  ;;  %v1705_v27 = vld [vmem:[#allocation2 + $0x8] sm:$0xff]  ;;  %v340_v28 = vmul.f32 %v1216_v1, %v1701_v25  ;;  %v1710_v31 = vld [vmem:[#allocation2] sm:$0xff]  ;;  %s1418_s14 = scalar_lea.hbm %s1417_s11, 128  ;;  %p1423_p10 = scmp.lt.s32.totalorder %s1417_s11, %s2168_s4 }
  0x38   : > { %v339_v29 = vmul.f32 %v1216_v1, %v1703_v26  ;;  %v338_v30 = vmul.f32 %v1216_v1, %v1705_v27  ;;  %v337_v32 = vmul.f32 %v1216_v1, %v1710_v31  ;;  %p1419_p5 = scmp.ne.s32.totalorder %s1417_s11, %s1418_s14  ;;  %p1424_p11 = scmp.lt.s32.totalorder %s1422_s7, %s1418_s14 }
  0x3a   : > { %p1420_p6 = pnand %p1419_p5, %p1576_p8  ;;  %p1425_p12 = por %p1424_p11, %p1423_p10 }
  0x3c   : > { %p1421_p7 = pneg %p1420_p6 }
  0x3d   : > { %381 = vadd.xlane.f32.xlu0 %v351_v10 }
  0x3e   : > { %377 = vadd.xlane.f32.xlu1 %v349_v11  ;;  %373 = vadd.xlane.f32.xlu2 %v347_v12  ;;  %p1426_p13 = pnand %p1425_p12, %p1421_p7 }
  0x45   : > { %371 = vadd.xlane.f32.xlu0 %v346_v16 }
  0x46   : > { %369 = vadd.xlane.f32.xlu1 %v345_v17  ;;  %367 = vadd.xlane.f32.xlu2 %v344_v18 }
  0x4d   : > { %365 = vadd.xlane.f32.xlu0 %v343_v22 }
  0x4e   : > { %363 = vadd.xlane.f32.xlu1 %v342_v23  ;;  %361 = vadd.xlane.f32.xlu2 %v341_v24 }
  0x55   : > { %359 = vadd.xlane.f32.xlu0 %v340_v28 }
  0x56   : > { %357 = vadd.xlane.f32.xlu1 %v339_v29  ;;  %355 = vadd.xlane.f32.xlu2 %v338_v30 }
  0x5d   : > { %353 = vadd.xlane.f32.xlu0 %v337_v32 }
  0xa8   : > { %v384_v33 = vpop.xlane.xlu0 %383 }
  0xa9   : > { %v380_v34 = vpop.xlane.xlu1 %379  ;;  %vm400_vm0 = vcmp.ge.f32.partialorder %v384_v33, 0.0  ;;  %v416_v35 = vmul.f32 0.2, %v384_v33  ;;  %v376_v37 = vpop.xlane.xlu2 %375 }
  0xaa   : > { %vm398_vm1 = vcmp.ge.f32.partialorder %v380_v34, 0.0  ;;  %v414_v36 = vmul.f32 0.2, %v380_v34  ;;  %v412_v41 = vmul.f32 0.2, %v376_v37  ;;  %vm396_vm2 = vcmp.ge.f32.partialorder %v376_v37, 0.0 }
  0xab   : > { %v432_v38 = vsel %vm400_vm0, %v384_v33, %v416_v35 }
  0xac   : > { %v448_v39 = vsub.f32 0.0, %v432_v38  ;;  %v430_v40 = vsel %vm398_vm1, %v380_v34, %v414_v36  ;;  %v428_v46 = vsel %vm396_vm2, %v376_v37, %v412_v41 }
  0xad   : > { %v446_v43 = vsub.f32 0.0, %v430_v40  ;;  %v444_v53 = vsub.f32 0.0, %v428_v46 }
  0xae   : > { %v479_v42 = vmul.f32 1.442695, %v448_v39 }
  0xaf   : > { %v475_v51 = vmul.f32 1.442695, %v446_v43  ;;  %v471_v63 = vmul.f32 1.442695, %v444_v53 }
  0xb0   : > { %1218 = vpow2.f32 %v479_v42  ;;  %v382_v44 = vpop.xlane.xlu0 %381 }
  0xb1   : > { %v378_v45 = vpop.xlane.xlu1 %377  ;;  %vm399_vm3 = vcmp.ge.f32.partialorder %v382_v44, 0.0  ;;  %v415_v47 = vmul.f32 0.2, %v382_v44  ;;  %v374_v48 = vpop.xlane.xlu2 %373  ;;  %1220 = vpow2.f32 %v475_v51 }
  0xb2   : > { %vm397_vm4 = vcmp.ge.f32.partialorder %v378_v45, 0.0  ;;  %v413_v49 = vmul.f32 0.2, %v378_v45  ;;  %vm395_vm5 = vcmp.ge.f32.partialorder %v374_v48, 0.0  ;;  %v411_v50 = vmul.f32 0.2, %v374_v48 }
  0xb3   : > { %v431_v52 = vsel %vm399_vm3, %v382_v44, %v415_v47 }
  0xb4   : > { %v447_v54 = vsub.f32 0.0, %v431_v52  ;;  %v429_v55 = vsel %vm397_vm4, %v378_v45, %v413_v49  ;;  %v427_v56 = vsel %vm395_vm5, %v374_v48, %v411_v50 }
  0xb5   : > { %v445_v57 = vsub.f32 0.0, %v429_v55  ;;  %v443_v58 = vsub.f32 0.0, %v427_v56 }
  0xb6   : > { %v1219_v59 = vpop.eup %1218  ;;  %v477_v60 = vmul.f32 1.442695, %v447_v54 }
  0xb7   : > { %v473_v61 = vmul.f32 1.442695, %v445_v57  ;;  %v496_v62 = vmul.f32 %v1219_v59, %v1665_v0  ;;  %v469_v5 = vmul.f32 1.442695, %v443_v58  ;;  %v1221_v22 = vpop.eup %1220 }
  0xb8   : > { %1222 = vpow2.f32 %v477_v60  ;;  %v372_v1 = vpop.xlane.xlu0 %371  ;;  %v494_v38 = vmul.f32 %v1221_v22, %v1667_v2 }
  0xb9   : > { %v370_v4 = vpop.xlane.xlu1 %369  ;;  %vm394_vm6 = vcmp.ge.f32.partialorder %v372_v1, 0.0  ;;  %v410_v6 = vmul.f32 0.2, %v372_v1  ;;  %497 = vmatpush.msra.mxu0 %v496_v62  ;;  %1072 = vmatpush.msra.mxu1 %v496_v62  ;;  %v368_v10 = vpop.xlane.xlu2 %367  ;;  %1224 = vpow2.f32 %v473_v61 }
  0xba   : > { %vm393_vm7 = vcmp.ge.f32.partialorder %v370_v4, 0.0  ;;  %1073 = vmatpush.msra.mxu2 %v496_v62  ;;  %1074 = vmatpush.msra.mxu3 %v496_v62  ;;  %v409_v11 = vmul.f32 0.2, %v370_v4  ;;  %vm392_vm8 = vcmp.ge.f32.partialorder %v368_v10, 0.0  ;;  %v408_v12 = vmul.f32 0.2, %v368_v10 }
  0xbb   : > { %v426_v16 = vsel %vm394_vm6, %v372_v1, %v410_v6  ;;  %1226 = vpow2.f32 %v471_v63 }
  0xbc   : > { %v442_v0 = vsub.f32 0.0, %v426_v16  ;;  %v425_v17 = vsel %vm393_vm7, %v370_v4, %v409_v11  ;;  %v424_v18 = vsel %vm392_vm8, %v368_v10, %v408_v12  ;;  %1228 = vpow2.f32 %v469_v5 }
  0xbd   : > { %v441_v23 = vsub.f32 0.0, %v425_v17  ;;  %v440_v24 = vsub.f32 0.0, %v424_v18 }
  0xbe   : > { %v1223_v28 = vpop.eup %1222  ;;  %v467_v29 = vmul.f32 1.442695, %v442_v0 }
  0xbf   : > { %v465_v30 = vmul.f32 1.442695, %v441_v23  ;;  %v495_v32 = vmul.f32 %v1223_v28, %v1674_v7  ;;  %v1225_v33 = vpop.eup %1224  ;;  %v463_v34 = vmul.f32 1.442695, %v440_v24 }
  0xc0   : > { %1230 = vpow2.f32 %v467_v29  ;;  %v366_v35 = vpop.xlane.xlu0 %365  ;;  %v493_v43 = vmul.f32 %v1225_v33, %v1676_v8 }
  0xc1   : > { %v364_v36 = vpop.xlane.xlu1 %363  ;;  %vm391_vm9 = vcmp.ge.f32.partialorder %v366_v35, 0.0  ;;  %v407_v37 = vmul.f32 0.2, %v366_v35  ;;  %498 = vmatpush.msra.mxu0 %v495_v32  ;;  %1075 = vmatpush.msra.mxu1 %v495_v32  ;;  %v362_v39 = vpop.xlane.xlu2 %361  ;;  %1232 = vpow2.f32 %v465_v30 }
  0xc2   : > { %vm390_vm10 = vcmp.ge.f32.partialorder %v364_v36, 0.0  ;;  %v1227_v40 = vpop.eup %1226  ;;  %1076 = vmatpush.msra.mxu2 %v495_v32  ;;  %1077 = vmatpush.msra.mxu3 %v495_v32  ;;  %v406_v41 = vmul.f32 0.2, %v364_v36  ;;  %vm389_vm11 = vcmp.ge.f32.partialorder %v362_v39, 0.0  ;;  %v405_v7 = vmul.f32 0.2, %v362_v39 }
  0xc3   : > { %v423_v42 = vsel %vm391_vm9, %v366_v35, %v407_v37  ;;  %499 = vmatpush.msra.mxu0 %v494_v38  ;;  %1078 = vmatpush.msra.mxu1 %v494_v38  ;;  %v1229_v44 = vpop.eup %1228  ;;  %1234 = vpow2.f32 %v463_v34  ;;  %v492_v49 = vmul.f32 %v1227_v40, %v1669_v3  ;;  %v317_v35 = vld [vmem:[#allocation8] sm:$0xff]  ;;  %v330_v40 = vld [vmem:[#allocation8 + $0x68] sm:$0xff] }
  0xc4   : > { %v439_v45 = vsub.f32 0.0, %v423_v42  ;;  %v422_v46 = vsel %vm390_vm10, %v364_v36, %v406_v41  ;;  %1079 = vmatpush.msra.mxu2 %v494_v38  ;;  %1080 = vmatpush.msra.mxu3 %v494_v38  ;;  %v421_v2 = vsel %vm389_vm11, %v362_v39, %v405_v7  ;;  %v491_v53 = vmul.f32 %v1229_v44, %v1678_v9  ;;  %v321_v36 = vld [vmem:[#allocation8 + $0x20] sm:$0xff]  ;;  %v322_v38 = vld [vmem:[#allocation8 + $0x28] sm:$0xff]  ;;  %v319_v41 = vld [vmem:[#allocation8 + $0x10] sm:$0xff] }
  0xc5   : > { %v438_v47 = vsub.f32 0.0, %v422_v46  ;;  %v437_v48 = vsub.f32 0.0, %v421_v2  ;;  %500 = vmatpush.msra.mxu0 %v493_v43  ;;  %1081 = vmatpush.msra.mxu1 %v493_v43  ;;  %v329_v37 = vld [vmem:[#allocation8 + $0x60] sm:$0xff]  ;;  %v326_v39 = vld [vmem:[#allocation8 + $0x48] sm:$0xff]  ;;  %v327_v7 = vld [vmem:[#allocation8 + $0x50] sm:$0xff]  ;;  %v1498_v2 = vmov 127  }
  0xc6   : > { %v1231_v50 = vpop.eup %1230  ;;  %v461_v51 = vmul.f32 1.442695, %v439_v45  ;;  %1082 = vmatpush.msra.mxu2 %v493_v43  ;;  %1083 = vmatpush.msra.mxu3 %v493_v43  ;;  %v331_v42 = vld [vmem:[#allocation8 + $0x70] sm:$0xff]  ;;  %v320_v43 = vld [vmem:[#allocation8 + $0x18] sm:$0xff] }
  0xc7   : > { %v459_v52 = vmul.f32 1.442695, %v438_v47  ;;  %v457_v8 = vmul.f32 1.442695, %v437_v48  ;;  %501 = vmatpush.msra.mxu0 %v492_v49  ;;  %1084 = vmatpush.msra.mxu1 %v492_v49  ;;  %v1233_v54 = vpop.eup %1232  ;;  %v490_v57 = vmul.f32 %v1231_v50, %v1683_v13  ;;  %v324_v44 = vld [vmem:[#allocation8 + $0x38] sm:$0xff] }
  0xc8   : > { %1236 = vpow2.f32 %v461_v51  ;;  %1085 = vmatpush.msra.mxu2 %v492_v49  ;;  %1086 = vmatpush.msra.mxu3 %v492_v49  ;;  %v360_v55 = vpop.xlane.xlu0 %359  ;;  %v489_v62 = vmul.f32 %v1233_v54, %v1685_v14  ;;  %v328_v45 = vld [vmem:[#allocation8 + $0x58] sm:$0xff] }
  0xc9   : > { %v358_v56 = vpop.xlane.xlu1 %357  ;;  %1238 = vpow2.f32 %v459_v52  ;;  %vm388_vm12 = vcmp.ge.f32.partialorder %v360_v55, 0.0  ;;  %v404_v3 = vmul.f32 0.2, %v360_v55  ;;  %502 = vmatpush.msra.mxu0 %v491_v53  ;;  %1087 = vmatpush.msra.mxu1 %v491_v53  ;;  %v356_v58 = vpop.xlane.xlu2 %355  ;;  %v332_v46 = vld [vmem:[#allocation8 + $0x78] sm:$0xff] }
  0xca   : > { %vm387_vm13 = vcmp.ge.f32.partialorder %v358_v56, 0.0  ;;  %v1235_v59 = vpop.eup %1234  ;;  %1240 = vpow2.f32 %v457_v8  ;;  %1088 = vmatpush.msra.mxu2 %v491_v53  ;;  %1089 = vmatpush.msra.mxu3 %v491_v53  ;;  %v403_v9 = vmul.f32 0.2, %v358_v56  ;;  %vm386_vm14 = vcmp.ge.f32.partialorder %v356_v58, 0.0 }
  0xcb   : > { %v402_v60 = vmul.f32 0.2, %v356_v58  ;;  %v420_v61 = vsel %vm388_vm12, %v360_v55, %v404_v3  ;;  %503 = vmatpush.msra.mxu0 %v490_v57  ;;  %1090 = vmatpush.msra.mxu1 %v490_v57  ;;  %v488_v6 = vmul.f32 %v1235_v59, %v1687_v15 }
  0xcc   : > { %v436_v13 = vsub.f32 0.0, %v420_v61  ;;  %v419_v63 = vsel %vm387_vm13, %v358_v56, %v403_v9  ;;  %1091 = vmatpush.msra.mxu2 %v490_v57  ;;  %1092 = vmatpush.msra.mxu3 %v490_v57 }
  0xcd   : > { %v418_v1 = vsel %vm386_vm14, %v356_v58, %v402_v60  ;;  %v435_v4 = vsub.f32 0.0, %v419_v63  ;;  %504 = vmatpush.msra.mxu0 %v489_v62  ;;  %1093 = vmatpush.msra.mxu1 %v489_v62 }
  0xce   : > { %v434_v5 = vsub.f32 0.0, %v418_v1  ;;  %v1237_v10 = vpop.eup %1236  ;;  %v455_v11 = vmul.f32 1.442695, %v436_v13  ;;  %1094 = vmatpush.msra.mxu2 %v489_v62  ;;  %1095 = vmatpush.msra.mxu3 %v489_v62 }
  0xcf   : > { %v1239_v12 = vpop.eup %1238  ;;  %v453_v16 = vmul.f32 1.442695, %v435_v4  ;;  %505 = vmatpush.msra.mxu0 %v488_v6  ;;  %1096 = vmatpush.msra.mxu1 %v488_v6  ;;  %v487_v14 = vmul.f32 %v1237_v10, %v1692_v19 }
  0xd0   : > { %v451_v0 = vmul.f32 1.442695, %v434_v5  ;;  %v1241_v17 = vpop.eup %1240  ;;  %1242 = vpow2.f32 %v455_v11  ;;  %1097 = vmatpush.msra.mxu2 %v488_v6  ;;  %1098 = vmatpush.msra.mxu3 %v488_v6  ;;  %v354_v18 = vpop.xlane.xlu0 %353  ;;  %v486_v22 = vmul.f32 %v1239_v12, %v1694_v20 }
  0xd1   : > { %1244 = vpow2.f32 %v453_v16  ;;  %vm385_vm15 = vcmp.ge.f32.partialorder %v354_v18, 0.0  ;;  %v401_v15 = vmul.f32 0.2, %v354_v18  ;;  %506 = vmatpush.msra.mxu0 %v487_v14  ;;  %1099 = vmatpush.msra.mxu1 %v487_v14  ;;  %v485_v23 = vmul.f32 %v1241_v17, %v1696_v21 }
  0xd2   : > { %1246 = vpow2.f32 %v451_v0  ;;  %1100 = vmatpush.msra.mxu2 %v487_v14  ;;  %1101 = vmatpush.msra.mxu3 %v487_v14 }
  0xd3   : > { %v417_v24 = vsel %vm385_vm15, %v354_v18, %v401_v15  ;;  %507 = vmatpush.msra.mxu0 %v486_v22  ;;  %1102 = vmatpush.msra.mxu1 %v486_v22 }
  0xd4   : > { %v433_v19 = vsub.f32 0.0, %v417_v24  ;;  %1103 = vmatpush.msra.mxu2 %v486_v22  ;;  %1104 = vmatpush.msra.mxu3 %v486_v22 }
  0xd5   : > { %508 = vmatpush.msra.mxu0 %v485_v23  ;;  %1105 = vmatpush.msra.mxu1 %v485_v23 }
  0xd6   : > { %v1243_v28 = vpop.eup %1242  ;;  %v449_v20 = vmul.f32 1.442695, %v433_v19  ;;  %1106 = vmatpush.msra.mxu2 %v485_v23  ;;  %1107 = vmatpush.msra.mxu3 %v485_v23 }
  0xd7   : > { %v1245_v29 = vpop.eup %1244  ;;  %v484_v30 = vmul.f32 %v1243_v28, %v1701_v25  ;;  %1213 = vset.pattern.permute.xlu1 %v1498_v2  ;;  %1214 = vset.pattern.permute.xlu0 %v1498_v2 }
  0xd8   : > { %v1247_v32 = vpop.eup %1246  ;;  %1248 = vpow2.f32 %v449_v20  ;;  %v483_v21 = vmul.f32 %v1245_v29, %v1703_v26  ;;  %v325_v26 = vld [vmem:[#allocation8 + $0x40] sm:$0xff]  ;;  %1215 = vset.pattern.permute.xlu2 %v1498_v2 }
  0xd9   : > { %509 = vmatpush.msra.mxu0 %v484_v30  ;;  %1108 = vmatpush.msra.mxu1 %v484_v30  ;;  %v482_v33 = vmul.f32 %v1247_v32, %v1705_v27  ;;  %v318_v27 = vld [vmem:[#allocation8 + $0x8] sm:$0xff] }
  0xda   : > { %1109 = vmatpush.msra.mxu2 %v484_v30  ;;  %1110 = vmatpush.msra.mxu3 %v484_v30 }
  0xdb   : > { %510 = vmatpush.msra.mxu0 %v483_v21  ;;  %1111 = vmatpush.msra.mxu1 %v483_v21 }
  0xdc   : > { %1112 = vmatpush.msra.mxu2 %v483_v21  ;;  %1113 = vmatpush.msra.mxu3 %v483_v21 }
  0xdd   : > { %511 = vmatpush.msra.mxu0 %v482_v33  ;;  %1114 = vmatpush.msra.mxu1 %v482_v33 }
  0xde   : > { %v1249_v34 = vpop.eup %1248  ;;  %1115 = vmatpush.msra.mxu2 %v482_v33  ;;  %1116 = vmatpush.msra.mxu3 %v482_v33 }
  0xdf   : > { %v481_v25 = vmul.f32 %v1249_v34, %v1710_v31  ;;  %v323_v31 = vld [vmem:[#allocation8 + $0x30] sm:$0xff] }
  0xe1   : > { %512 = vmatpush.msra.mxu0 %v481_v25  ;;  %1117 = vmatpush.msra.mxu1 %v481_v25 }
  0xe2   : > { %1118 = vmatpush.msra.mxu2 %v481_v25  ;;  %1119 = vmatpush.msra.mxu3 %v481_v25 }
  0xe3   : > { %513 = vmatmul.f32.vlgmr.msra.gmra.mxu0 %v317_v35  ;;  %525 = vmatmul.f32.vlgmr.msra.gmra.mxu1 %v321_v36 }
  0xe4   : > { %537 = vmatmul.f32.vlgmr.msra.gmra.mxu2 %v325_v26  ;;  %549 = vmatmul.f32.vlgmr.msra.gmra.mxu3 %v329_v37 }
  0xeb   : > { %516 = vmatmul.f32.gmra.mxu0 %v318_v27  ;;  %528 = vmatmul.f32.gmra.mxu1 %v322_v38 }
  0xec   : > { %540 = vmatmul.f32.gmra.mxu2 %v326_v39  ;;  %552 = vmatmul.f32.gmra.mxu3 %v330_v40 }
  0xf3   : > { %531 = vmatmul.f32.gmra.mxu1 %v323_v31  ;;  %519 = vmatmul.f32.gmra.mxu0 %v319_v41 }
  0xf4   : > { %543 = vmatmul.f32.gmra.mxu2 %v327_v7  ;;  %555 = vmatmul.f32.gmra.mxu3 %v331_v42 }
  0xfb   : > { %522 = vmatmul.f32.gmra.mxu0 %v320_v43  ;;  %534 = vmatmul.f32.gmra.mxu1 %v324_v44 }
  0xfc   : > { %546 = vmatmul.f32.gmra.mxu2 %v328_v45  ;;  %558 = vmatmul.f32.gmra.mxu3 %v332_v46 }
 0x160   : > { %v1730_v47 = vpop.f32.mrf.mxu0  ;;  %v1732_v48 = vpop.f32.mrf.mxu1 }
 0x161   : > { %1250 = vrcp.f32 %v1730_v47  ;;  %v571_v49 = vand.u32 2147483647, %v1730_v47  ;;  %v573_v8 = vand.u32 2147483648, %v1730_v47  ;;  %vm567_vm0 = vweird.f32 %v1730_v47 }
 0x162   : > { %1252 = vrcp.f32 %v1732_v48  ;;  %v627_v57 = vand.u32 2147483647, %v1732_v48  ;;  %vm623_vm1 = vweird.f32 %v1732_v48  ;;  %v629_v58 = vand.u32 2147483648, %v1732_v48 }
 0x163   : > { %vm1758_vm2 = vcmp.eq.f32.partialorder %v571_v49, 8.507059e+37  ;;  %v574_v62 = vor.u32 1.1754944e-38, %v573_v8 }
 0x164   : > { %vm1765_vm4 = vcmp.eq.f32.partialorder %v627_v57, 8.507059e+37  ;;  %v630_v10 = vor.u32 1.1754944e-38, %v629_v58 }
 0x167   : > { %v1251_v50 = vpop.eup %1250  ;;  %v1737_v51 = vpop.f32.mrf.mxu2 }
 0x168   : > { %v1739_v52 = vpop.f32.mrf.mxu3  ;;  %v1742_v53 = vpop.eup %1252  ;;  %v563_v54 = vmul.f32 %v1251_v50, %v1730_v47  ;;  %1254 = vrcp.f32 %v1737_v51  ;;  %vm568_vm3 = vweird.f32 %v1251_v50  ;;  %v683_v0 = vand.u32 2147483647, %v1737_v51 }
 0x169   : > { %v1746_v55 = vpop.f32.mrf.mxu0  ;;  %v1748_v56 = vpop.f32.mrf.mxu1  ;;  %v619_v3 = vmul.f32 %v1742_v53, %v1732_v48  ;;  %1256 = vrcp.f32 %v1739_v52  ;;  %v741_v60 = vand.u32 2147483648, %v1739_v52  ;;  %v739_v63 = vand.u32 2147483647, %v1739_v52  ;;  %vm1791_vm8 = vmor %vm567_vm0, %vm568_vm3 }
 0x16a   : > { %v564_v59 = vsub.f32 1.0, %v563_v54  ;;  %1258 = vrcp.f32 %v1746_v55  ;;  %v585_v4 = vand.u32 2147483647, %v1746_v55  ;;  %v587_v5 = vand.u32 2147483648, %v1746_v55 }
 0x16b   : > { %v620_v61 = vsub.f32 1.0, %v619_v3  ;;  %1260 = vrcp.f32 %v1748_v56  ;;  %vm735_vm5 = vweird.f32 %v1739_v52  ;;  %vm624_vm6 = vweird.f32 %v1742_v53 }
 0x16c   : > { %v565_v13 = vmul.f32 %v1251_v50, %v564_v59  ;;  %v1776_v16 = vor.u32 1.1754944e-38, %v741_v60  ;;  %vm581_vm7 = vweird.f32 %v1746_v55  ;;  %v1796_v24 = vor.u32 1.1754944e-38, %v587_v5  ;;  %vm1830_vm11 = vmor %vm623_vm1, %vm624_vm6 }
 0x16d   : > { %v621_v6 = vmul.f32 %v1742_v53, %v620_v61  ;;  %v685_v19 = vand.u32 2147483648, %v1737_v51  ;;  %vm1810_vm9 = vcmp.eq.f32.partialorder %v739_v63, 8.507059e+37  ;;  %vm1814_vm10 = vcmp.eq.f32.partialorder %v585_v4, 8.507059e+37 }
 0x16e   : > { %v1774_v11 = vpop.eup %1254  ;;  %v566_v12 = vadd.f32 %v1251_v50, %v565_v13  ;;  %v641_v34 = vand.u32 2147483647, %v1748_v56  ;;  %vm679_vm12 = vweird.f32 %v1737_v51  ;;  %vm637_vm13 = vweird.f32 %v1748_v56 }
 0x16f   : > { %v1780_v14 = vpop.eup %1256  ;;  %v675_v17 = vmul.f32 %v1774_v11, %v1737_v51  ;;  %v1784_v18 = vpop.f32.mrf.mxu2  ;;  %v622_v23 = vadd.f32 %v1742_v53, %v621_v6  ;;  %vm680_vm15 = vweird.f32 %v1774_v11  ;;  %vm1852_vm1 = vcmp.eq.f32.partialorder %v683_v0, 8.507059e+37 }
 0x170   : > { %v1786_v22 = vpop.f32.mrf.mxu3  ;;  %v1799_v28 = vpop.eup %1258  ;;  %v731_v20 = vmul.f32 %v1780_v14, %v1739_v52  ;;  %1262 = vrcp.f32 %v1784_v18  ;;  %v570_v30 = vsel %vm1791_vm8, %v1251_v50, %v566_v12  ;;  %vm736_vm14 = vweird.f32 %v1780_v14  ;;  %vm681_vm8 = vmor %vm679_vm12, %vm680_vm15 }
 0x171   : > { %v1804_v29 = vpop.f32.mrf.mxu1  ;;  %v1808_v32 = vpop.f32.mrf.mxu0  ;;  %v676_v35 = vsub.f32 1.0, %v675_v17  ;;  %v577_v36 = vmul.f32 %v1799_v28, %v1746_v55  ;;  %1264 = vrcp.f32 %v1786_v22  ;;  %v575_v26 = vsel %vm1758_vm2, %v574_v62, %v570_v30  ;;  %vm1861_vm2 = vmor %vm735_vm5, %vm736_vm14 }
 0x172   : > { %v1819_v25 = vpop.eup %1260  ;;  %v732_v27 = vsub.f32 1.0, %v731_v20  ;;  %1266 = vrcp.f32 %v1804_v29  ;;  %788 = vperm.xlu1 %1213, %v575_v26   ;;  %v626_v39 = vsel %vm1830_vm11, %v1742_v53, %v622_v23  ;;  %vm582_vm0 = vweird.f32 %v1799_v28 }
 0x173   : > { %v633_v38 = vmul.f32 %v1819_v25, %v1748_v56  ;;  %v578_v40 = vsub.f32 1.0, %v577_v36  ;;  %1268 = vrcp.f32 %v1808_v32  ;;  %v697_v7 = vand.u32 2147483647, %v1784_v18 }
 0x174   : > { %v733_v41 = vmul.f32 %v1780_v14, %v732_v27  ;;  %v631_v42 = vsel %vm1765_vm4, %v630_v10, %v626_v39  ;;  %v677_v44 = vmul.f32 %v1774_v11, %v676_v35  ;;  %vm693_vm3 = vweird.f32 %v1784_v18  ;;  %vm1880_vm4 = vmor %vm581_vm7, %vm582_vm0 }
 0x175   : > { %v634_v31 = vsub.f32 1.0, %v633_v38  ;;  %v579_v43 = vmul.f32 %v1799_v28, %v578_v40  ;;  %v699_v50 = vand.u32 2147483648, %v1784_v18  ;;  %v686_v8 = vor.u32 1.1754944e-38, %v685_v19 }
 0x176   : > { %v1856_v46 = vpop.eup %1262  ;;  %v734_v2 = vadd.f32 %v1780_v14, %v733_v41  ;;  %vm1884_vm5 = vcmp.eq.f32.partialorder %v697_v7, 8.507059e+37  ;;  %vm638_vm6 = vweird.f32 %v1819_v25  ;;  %v678_v63 = vadd.f32 %v1774_v11, %v677_v44 }
 0x177   : > { %v1867_v53 = vpop.eup %1264  ;;  %v689_v54 = vmul.f32 %v1856_v46, %v1784_v18  ;;  %v1871_v57 = vpop.f32.mrf.mxu2  ;;  %v580_v58 = vadd.f32 %v1799_v28, %v579_v43  ;;  %v635_v60 = vmul.f32 %v1819_v25, %v634_v31  ;;  %vm694_vm7 = vweird.f32 %v1856_v46 }
 0x178   : > { %v1873_v3 = vpop.f32.mrf.mxu3  ;;  %v1890_v61 = vpop.eup %1266  ;;  %1270 = vrcp.f32 %v1871_v57  ;;  %v738_v62 = vsel %vm1861_vm2, %v1780_v14, %v734_v2  ;;  %v700_v0 = vor.u32 1.1754944e-38, %v699_v50  ;;  %v682_v23 = vsel %vm681_vm8, %v1774_v11, %v678_v63  ;;  %vm1950_vm11 = vmor %vm693_vm3, %vm694_vm7 }
 0x179   : > { %v1897_v13 = vpop.f32.mrf.mxu0  ;;  %v1900_v1 = vpop.eup %1268  ;;  %v690_v4 = vsub.f32 1.0, %v689_v54  ;;  %v647_v5 = vmul.f32 %v1890_v61, %v1804_v29  ;;  %1272 = vrcp.f32 %v1873_v3  ;;  %v743_v6 = vsel %vm1810_vm9, %v1776_v16, %v738_v62  ;;  %vm1937_vm9 = vmor %vm637_vm13, %vm638_vm6 }
 0x17a   : > { %v591_v10 = vmul.f32 %v1900_v1, %v1808_v32  ;;  %848 = vperm.xlu0 %1214, %v743_v6   ;;  %808 = vperm.xlu1 %1213, %v631_v42   ;;  %v584_v12 = vsel %vm1880_vm4, %v1799_v28, %v580_v58  ;;  %1274 = vrcp.f32 %v1897_v13  ;;  %v1918_v14 = vpop.f32.mrf.mxu1  ;;  %v1922_v16 = vmul.f32 %v1867_v53, %v1786_v22 }
 0x17b   : > { %v589_v17 = vsel %vm1814_vm10, %v1796_v24, %v584_v12  ;;  %v691_v15 = vmul.f32 %v1856_v46, %v690_v4  ;;  %v648_v19 = vsub.f32 1.0, %v647_v5  ;;  %v687_v20 = vsel %vm1852_vm1, %v686_v8, %v682_v23 }
 0x17c   : > { %v592_v28 = vsub.f32 1.0, %v591_v10  ;;  %793 = vperm.xlu2 %1215, %v589_v17   ;;  %v636_v30 = vadd.f32 %v1819_v25, %v635_v60  ;;  %v643_v11 = vand.u32 2147483648, %v1748_v56  ;;  %1276 = vrcp.f32 %v1918_v14 }
 0x17d   : > { %v692_v21 = vadd.f32 %v1856_v46, %v691_v15  ;;  %vm595_vm10 = vweird.f32 %v1808_v32  ;;  %vm596_vm12 = vweird.f32 %v1900_v1  ;;  %v599_v37 = vand.u32 2147483647, %v1808_v32 }
 0x17e   : > { %v1944_v33 = vpop.eup %1270  ;;  %v640_v36 = vsel %vm1937_vm9, %v1819_v25, %v636_v30  ;;  %v593_v26 = vmul.f32 %v1900_v1, %v592_v28  ;;  %v644_v25 = vor.u32 1.1754944e-38, %v643_v11  ;;  %vm1971_vm13 = vmor %vm595_vm10, %vm596_vm12  ;;  %v601_v7 = vand.u32 2147483648, %v1808_v32 }
 0x17f   : > { %v1960_v27 = vpop.eup %1272  ;;  %v703_v38 = vmul.f32 %v1944_v33, %v1871_v57  ;;  %v1964_v39 = vpop.f32.mrf.mxu2  ;;  %v696_v31 = vsel %vm1950_vm11, %v1856_v46, %v692_v21  ;;  %vm642_vm14 = vcmp.eq.f32.partialorder %v641_v34, 8.507059e+37  ;;  %vm600_vm15 = vcmp.eq.f32.partialorder %v599_v37, 8.507059e+37 }
 0x180   : > { %v1966_v40 = vpop.f32.mrf.mxu3  ;;  %v1976_v42 = vpop.eup %1274  ;;  %v1980_v43 = vmul.f32 %v1960_v27, %v1873_v3  ;;  %1278 = vrcp.f32 %v1964_v39  ;;  %v701_v44 = vsel %vm1884_vm5, %v700_v0, %v696_v31  ;;  %v594_v45 = vadd.f32 %v1900_v1, %v593_v26 }
 0x181   : > { %v704_v46 = vsub.f32 1.0, %v703_v38  ;;  %1280 = vrcp.f32 %v1966_v40  ;;  %v605_v2 = vmul.f32 %v1976_v42, %v1897_v13  ;;  %v645_v49 = vsel %vm642_vm14, %v644_v25, %v640_v36 }
 0x182   : > { %833 = vperm.xlu0 %1214, %v701_v44   ;;  %828 = vperm.xlu1 %1213, %v687_v20   ;;  %v598_v50 = vsel %vm1971_vm13, %v1900_v1, %v594_v45  ;;  %v602_v8 = vor.u32 1.1754944e-38, %v601_v7  ;;  %v1994_v54 = vpop.eup %1276  ;;  %v760_v58 = vsub.f32 1.0, %v1980_v43  ;;  %v649_v59 = vmul.f32 %v1890_v61, %v648_v19 }
 0x183   : > { %vm651_vm0 = vweird.f32 %v1804_v29  ;;  %vm652_vm1 = vweird.f32 %v1890_v61  ;;  %v606_v34 = vsub.f32 1.0, %v605_v2  ;;  %v2002_v9 = vmul.f32 %v1994_v54, %v1918_v14 }
 0x184   : > { %813 = vperm.xlu2 %1215, %v645_v49   ;;  %v655_v60 = vand.u32 2147483647, %v1804_v29  ;;  %v657_v62 = vand.u32 2147483648, %v1804_v29  ;;  %v603_v63 = vsel %vm600_vm15, %v602_v8, %v598_v50  ;;  %v650_v1 = vadd.f32 %v1890_v61, %v649_v59  ;;  %vm653_vm3 = vmor %vm651_vm0, %vm652_vm1 }
 0x185   : > { %v705_v4 = vmul.f32 %v1944_v33, %v704_v46  ;;  %vm708_vm2 = vweird.f32 %v1944_v33  ;;  %vm707_vm5 = vweird.f32 %v1871_v57  ;;  %v711_v10 = vand.u32 2147483647, %v1871_v57 }
 0x186   : > { %v1279_v5 = vpop.eup %1278  ;;  %vm656_vm4 = vcmp.eq.f32.partialorder %v655_v60, 8.507059e+37  ;;  %v658_v6 = vor.u32 1.1754944e-38, %v657_v62  ;;  %v654_v17 = vsel %vm653_vm3, %v1890_v61, %v650_v1  ;;  %v713_v23 = vand.u32 2147483648, %v1871_v57  ;;  %vm709_vm6 = vmor %vm707_vm5, %vm708_vm2 }
 0x187   : > { %v1281_v12 = vpop.eup %1280  ;;  %v717_v0 = vmul.f32 %v1279_v5, %v1964_v39  ;;  %v706_v15 = vadd.f32 %v1944_v33, %v705_v4  ;;  %v662_v28 = vsub.f32 1.0, %v2002_v9  ;;  %vm712_vm7 = vcmp.eq.f32.partialorder %v711_v10, 8.507059e+37 }
 0x188   : > { %v773_v19 = vmul.f32 %v1281_v12, %v1966_v40  ;;  %v659_v20 = vsel %vm656_vm4, %v658_v6, %v654_v17  ;;  %v714_v24 = vor.u32 1.1754944e-38, %v713_v23  ;;  %vm777_vm8 = vweird.f32 %v1966_v40 }
 0x189   : > { %v718_v30 = vsub.f32 1.0, %v717_v0  ;;  %v710_v21 = vsel %vm709_vm6, %v1944_v33, %v706_v15  ;;  %vm778_vm9 = vweird.f32 %v1281_v12  ;;  %v781_v11 = vand.u32 2147483647, %v1966_v40 }
 0x18a   : > { %v774_v61 = vsub.f32 1.0, %v773_v19  ;;  %798 = vperm.xlu0 %1214, %v603_v63   ;;  %818 = vperm.xlu1 %1213, %v659_v20   ;;  %v783_v35 = vand.u32 2147483648, %v1966_v40  ;;  %v715_v36 = vsel %vm712_vm7, %v714_v24, %v710_v21  ;;  %vm722_vm10 = vweird.f32 %v1279_v5  ;;  %vm2028_vm12 = vmor %vm777_vm8, %vm778_vm9 }
 0x18b   : > { %v719_v26 = vmul.f32 %v1279_v5, %v718_v30  ;;  %v725_v37 = vand.u32 2147483647, %v1964_v39  ;;  %vm721_vm11 = vweird.f32 %v1964_v39  ;;  %v727_v33 = vand.u32 2147483648, %v1964_v39 }
 0x18c   : > { %838 = vperm.xlu2 %1215, %v715_v36   ;;  %v775_v38 = vmul.f32 %v1281_v12, %v774_v61  ;;  %v784_v31 = vor.u32 1.1754944e-38, %v783_v35  ;;  %v607_v7 = vmul.f32 %v1976_v42, %v606_v34  ;;  %vm609_vm14 = vweird.f32 %v1897_v13  ;;  %vm723_vm15 = vmor %vm721_vm11, %vm722_vm10  ;;  %v2074_v61 = vld [vmem:[%s265_s1] ss:$0 sm:$0xff] }
 0x18d   : > { %v720_v41 = vadd.f32 %v1279_v5, %v719_v26  ;;  %vm726_vm13 = vcmp.eq.f32.partialorder %v725_v37, 8.507059e+37  ;;  %v728_v44 = vor.u32 1.1754944e-38, %v727_v33  ;;  %vm610_vm0 = vweird.f32 %v1976_v42 }
 0x18e   : > { %v776_v43 = vadd.f32 %v1281_v12, %v775_v38  ;;  %v613_v45 = vand.u32 2147483647, %v1897_v13  ;;  %v608_v2 = vadd.f32 %v1976_v42, %v607_v7  ;;  %vm2037_vm1 = vmor %vm609_vm14, %vm610_vm0  ;;  %v615_v50 = vand.u32 2147483648, %v1897_v13 }
 0x18f   : > { %v724_v46 = vsel %vm723_vm15, %v1279_v5, %v720_v41  ;;  %v761_v8 = vmul.f32 %v1960_v27, %v760_v58  ;;  %vm782_vm2 = vcmp.eq.f32.partialorder %v781_v11, 8.507059e+37  ;;  %vm763_vm4 = vweird.f32 %v1873_v3 }
 0x190   : > { %v780_v59 = vsel %vm2028_vm12, %v1281_v12, %v776_v43  ;;  %v729_v34 = vsel %vm726_vm13, %v728_v44, %v724_v46  ;;  %vm614_vm3 = vcmp.eq.f32.partialorder %v613_v45, 8.507059e+37  ;;  %v612_v60 = vsel %vm2037_vm1, %v1976_v42, %v608_v2 }
 0x191   : > { %v785_v9 = vsel %vm782_vm2, %v784_v31, %v780_v59  ;;  %v616_v62 = vor.u32 1.1754944e-38, %v615_v50  ;;  %v762_v63 = vadd.f32 %v1960_v27, %v761_v8  ;;  %vm764_vm5 = vweird.f32 %v1960_v27 }
 0x192   : > { %863 = vperm.xlu0 %1214, %v785_v9   ;;  %843 = vperm.xlu1 %1213, %v729_v34   ;;  %v769_v58 = vand.u32 2147483648, %v1873_v3  ;;  %v663_v1 = vmul.f32 %v1994_v54, %v662_v28  ;;  %vm665_vm6 = vweird.f32 %v1918_v14  ;;  %vm666_vm7 = vweird.f32 %v1994_v54  ;;  %vm765_vm9 = vmor %vm763_vm4, %vm764_vm5 }
 0x193   : > { %v617_v4 = vsel %vm614_vm3, %v616_v62, %v612_v60  ;;  %v669_v42 = vand.u32 2147483647, %v1918_v14  ;;  %v746_v5 = vsub.f32 1.0, %v1922_v16  ;;  %v767_v6 = vand.u32 2147483647, %v1873_v3  ;;  %vm667_vm8 = vmor %vm665_vm6, %vm666_vm7 }
 0x194   : > { %803 = vperm.xlu2 %1215, %v617_v4   ;;  %v664_v10 = vadd.f32 %v1994_v54, %v663_v1  ;;  %v671_v12 = vand.u32 2147483648, %v1918_v14  ;;  %v766_v0 = vsel %vm765_vm9, %v1960_v27, %v762_v63  ;;  %v770_v15 = vor.u32 1.1754944e-38, %v769_v58 }
 0x195   : > { %vm670_vm10 = vcmp.eq.f32.partialorder %v669_v42, 8.507059e+37  ;;  %vm768_vm11 = vcmp.eq.f32.partialorder %v767_v6, 8.507059e+37  ;;  %v747_v16 = vmul.f32 %v1867_v53, %v746_v5  ;;  %vm749_vm12 = vweird.f32 %v1786_v22 }
 0x196   : > { %v668_v17 = vsel %vm667_vm8, %v1994_v54, %v664_v10  ;;  %v672_v23 = vor.u32 1.1754944e-38, %v671_v12  ;;  %v771_v19 = vsel %vm768_vm11, %v770_v15, %v766_v0  ;;  %vm750_vm13 = vweird.f32 %v1867_v53 }
 0x197   : > { %v748_v20 = vadd.f32 %v1867_v53, %v747_v16  ;;  %v755_v27 = vand.u32 2147483648, %v1786_v22  ;;  %v753_v54 = vand.u32 2147483647, %v1786_v22  ;;  %vm751_vm14 = vmor %vm749_vm12, %vm750_vm13 }
 0x198   : > { %v673_v28 = vsel %vm670_vm10, %v672_v23, %v668_v17 }
 0x199   : > { %v752_v30 = vsel %vm751_vm14, %v1867_v53, %v748_v20  ;;  %v756_v21 = vor.u32 1.1754944e-38, %v755_v27  ;;  %vm754_vm15 = vcmp.eq.f32.partialorder %v753_v54, 8.507059e+37 }
 0x19a   : > { %858 = vperm.xlu1 %1213, %v771_v19  }
 0x19b   : > { %v757_v24 = vsel %vm754_vm15, %v756_v21, %v752_v30 }
 0x19c   : > { %823 = vperm.xlu2 %1215, %v673_v28  }
 0x1a4   : > { %853 = vperm.xlu2 %1215, %v757_v24  }
 0x1d6   : > { %v794_v11 = vpop.permute.xlu2 %793 }
 0x1d7   : > { %v867_v35 = vmul.f32 %v794_v11, %v1746_v55 }
 0x1d9   : > { %v887_v36 = vmul.f32 %v2074_v61, %v867_v35 }
 0x1db   : > { %903 = vst [vmem:[%s2078_s21 + $0x8] sm:$0xff] %v887_v36 }
 0x1de   : > { %v814_v53 = vpop.permute.xlu2 %813 }
 0x1df   : > { %v871_v26 = vmul.f32 %v814_v53, %v1748_v56 }
 0x1e1   : > { %v891_v37 = vmul.f32 %v2074_v61, %v871_v26 }
 0x1e3   : > { %907 = vst [vmem:[%s2078_s21 + $0x28] sm:$0xff] %v891_v37 }
 0x1e4   : > { %v789_v38 = vpop.permute.xlu1 %788 }
 0x1e5   : > { %v866_v31 = vmul.f32 %v789_v38, %v1730_v47 }
 0x1e6   : > { %v839_v55 = vpop.permute.xlu2 %838 }
 0x1e7   : > { %v886_v33 = vmul.f32 %v2074_v61, %v866_v31  ;;  %v876_v25 = vmul.f32 %v839_v55, %v1871_v57 }
 0x1e9   : > { %902 = vst [vmem:[%s2078_s21] sm:$0xff] %v886_v33  ;;  %v896_v41 = vmul.f32 %v2074_v61, %v876_v25 }
 0x1eb   : > { %912 = vst [vmem:[%s2078_s21 + $0x50] sm:$0xff] %v896_v41 }
 0x1ec   : > { %v849_v7 = vpop.permute.xlu0 %848  ;;  %v809_v56 = vpop.permute.xlu1 %808 }
 0x1ed   : > { %v878_v43 = vmul.f32 %v849_v7, %v1739_v52  ;;  %v870_v44 = vmul.f32 %v809_v56, %v1732_v48 }
 0x1ee   : > { %v804_v45 = vpop.permute.xlu2 %803 }
 0x1ef   : > { %v898_v47 = vmul.f32 %v2074_v61, %v878_v43  ;;  %v890_v46 = vmul.f32 %v2074_v61, %v870_v44  ;;  %v869_v2 = vmul.f32 %v804_v45, %v1897_v13 }
 0x1f1   : > { %914 = vst [vmem:[%s2078_s21 + $0x60] sm:$0xff] %v898_v47  ;;  %v889_v57 = vmul.f32 %v2074_v61, %v869_v2 }
 0x1f2   : > { %906 = vst [vmem:[%s2078_s21 + $0x20] sm:$0xff] %v890_v46 }
 0x1f3   : > { %905 = vst [vmem:[%s2078_s21 + $0x18] sm:$0xff] %v889_v57 }
 0x1f4   : > { %v834_v49 = vpop.permute.xlu0 %833  ;;  %v829_v50 = vpop.permute.xlu1 %828 }
 0x1f5   : > { %v875_v52 = vmul.f32 %v834_v49, %v1784_v18  ;;  %v874_v48 = vmul.f32 %v829_v50, %v1737_v51 }
 0x1f6   : > { %v824_v8 = vpop.permute.xlu2 %823 }
 0x1f7   : > { %v895_v59 = vmul.f32 %v2074_v61, %v875_v52  ;;  %v894_v34 = vmul.f32 %v2074_v61, %v874_v48  ;;  %v873_v13 = vmul.f32 %v824_v8, %v1918_v14 }
 0x1f9   : > { %911 = vst [vmem:[%s2078_s21 + $0x48] sm:$0xff] %v895_v59  ;;  %v893_v9 = vmul.f32 %v2074_v61, %v873_v13 }
 0x1fa   : > { %910 = vst [vmem:[%s2078_s21 + $0x40] sm:$0xff] %v894_v34 }
 0x1fb   : > { %909 = vst [vmem:[%s2078_s21 + $0x38] sm:$0xff] %v893_v9 }
 0x1fc   : > { %v799_v60 = vpop.permute.xlu0 %798  ;;  %v819_v18 = vpop.permute.xlu1 %818 }
 0x1fd   : > { %v868_v51 = vmul.f32 %v799_v60, %v1808_v32  ;;  %v872_v62 = vmul.f32 %v819_v18, %v1804_v29 }
 0x1fe   : > { %v854_v63 = vpop.permute.xlu2 %853 }
 0x1ff   : > { %v888_v58 = vmul.f32 %v2074_v61, %v868_v51  ;;  %v892_v14 = vmul.f32 %v2074_v61, %v872_v62  ;;  %v879_v1 = vmul.f32 %v854_v63, %v1786_v22 }
 0x201   : > { %904 = vst [vmem:[%s2078_s21 + $0x10] sm:$0xff] %v888_v58  ;;  %v899_v4 = vmul.f32 %v2074_v61, %v879_v1 }
 0x202   : > { %908 = vst [vmem:[%s2078_s21 + $0x30] sm:$0xff] %v892_v14 }
 0x203   : > { %915 = vst [vmem:[%s2078_s21 + $0x68] sm:$0xff] %v899_v4 }
 0x204   : > { %v864_v42 = vpop.permute.xlu0 %863  ;;  %v844_v5 = vpop.permute.xlu1 %843 }
 0x205   : > { %v881_v29 = vmul.f32 %v864_v42, %v1966_v40  ;;  %v877_v32 = vmul.f32 %v844_v5, %v1964_v39 }
 0x207   : > { %v901_v6 = vmul.f32 %v2074_v61, %v881_v29  ;;  %v897_v10 = vmul.f32 %v2074_v61, %v877_v32 }
 0x209   : > { %917 = vst [vmem:[%s2078_s21 + $0x78] sm:$0xff] %v901_v6 }
 0x20a   : > { %913 = vst [vmem:[%s2078_s21 + $0x58] sm:$0xff] %v897_v10 }
 0x20c   : > { %v859_v22 = vpop.permute.xlu1 %858 }
 0x20d   : > { %v880_v40 = vmul.f32 %v859_v22, %v1873_v3 }
 0x20f   : > { %v900_v39 = vmul.f32 %v2074_v61, %v880_v40 }
 0x211   : > { %916 = vst [vmem:[%s2078_s21 + $0x70] sm:$0xff] %v900_v39 }
 0x212   : > { %1429 = shalt.err (!%p1426_p13)
}
 0x213   : > { %s1499_s5 = smov 128   ;;  %s1500_s24 = smov 8  }
 0x214   : > { %1132 = dma.vmem_to_hbm [thread:$0]  (%p1576_p8), %s934_s9, 2048, %s936_s10, %s919_s18, %s1499_s5, %s1499_s5, %s1500_s24  }
 0x215 PF: > { %p1157_p0 = scmp.ge.s32.totalorder %s1492_s20, 2  ;;  %s950_s6 = sand.u32 1, %s1472_s15  }
 0x216   : > { %s951_s1 = scalar_lea.sflag [#allocation4], %s950_s6 }
 0x217   : > { %p1149_p1 = pnand %p1157_p0, %p1583_p9 }
 0x219   : > { %p1150_p2 = pneg %p1149_p1 }
 0x21b   : > { %1467 = dma.done.wait (%p1150_p2), %s951_s1, 2048  }
 0x21c   : > { %1469 = vsyncadd (%p1150_p2), %s951_s1, 4294965248  ;;  %s22_s20 = sadd.s32 1, %s1492_s20   ;;  %s2213_s15 = smov %s1476_s16 }
 0x21d   : > { %p19_p4 = scmp.ge.s32.totalorder %s22_s20, 5   ;;  %s2214_s16 = smov %s1480_s17 }
 0x21e   : > { %s2215_s17 = smov %s1588_s29  ;;  %s2216_s18 = smov %s1488_s19 }
 0x21f   : > { %s2217_s19 = smov %s2219_s23  ;;  %21 = sbr.rel (!%p19_p4) target bundleno = 12 (0xc), region = 102 }
 0x224   :  { %957 = vsyncpa [#allocation3], 1 }
 0x225   :  { %959 = vsyncpa [#allocation3 + $0x1], 1 }
 0x226   :  { %960 = vsyncpa [#allocation6], 1 }
 0x227   :  { %962 = vsyncpa [#allocation6 + $0x1], 1 }
 0x228   :  { %963 = vsyncpa [#allocation9], 1 }
 0x229   :  { %964 = vsyncpa [#allocation4], 1 }
 0x22a   :  { %966 = vsyncpa [#allocation4 + $0x1], 1 }

</bundles_post_ra>
